<compile_context>
chip_gen: v7x
topology: tpu7x:2x2x1
jax: 0.10.0
libtpu: 0.0.40
codegen_flags: <defaults>
</compile_context>

<pallas_src>
import functools

import jax
import jax.numpy as jnp
from jax import lax
from jax.experimental import pallas as pl
from jax.experimental.pallas import tpu as pltpu


# ----------------------------------------------------------------------------
# Fused kernel: (im2col-H -> single bf16 matmul -> BN(batch stats) -> PReLU) x 2
# ----------------------------------------------------------------------------
def _conv_block2_kernel(x_ref, m1_ref, m2_ref, p1_ref, p2_ref, o_ref,
                        xcat1_ref, xcat2_ref, *, N, H, W, Cout, KH, eps):
    """x_ref : (N*H, W*Cin) f32, lane index = w*Cin + ci.
    m*_ref  : (KH*W*Cin_or_Cout, W*Cout) bf16 banded conv weights, K = dy-major.
    p*_ref  : (3, Cout) f32 rows = [gamma, beta, prelu_slope].
    o_ref   : (N*H, W*Cout) f32, lane index = w*Cout + co.
    xcat*   : VMEM f32 scratch im2col slabs (N*H, KH*W*C)."""
    WCo = W * Cout
    pad = KH // 2

    # 0/1 matrices folding (W*Cout,) lanes -> (Cout,) channels and back (lane l holds
    # channel l % Cout).  Built once, shared by both BN blocks; tiny MXU matmuls replace
    # lane<->(w,c) reshapes which would be relayout-heavy.
    lane_f = lax.broadcasted_iota(jnp.int32, (WCo, Cout), 0) % Cout
    chan_f = lax.broadcasted_iota(jnp.int32, (WCo, Cout), 1)
    fold = (lane_f == chan_f).astype(jnp.float32)            # (W*Cout, Cout)
    chan_e = lax.broadcasted_iota(jnp.int32, (Cout, WCo), 0)
    lane_e = lax.broadcasted_iota(jnp.int32, (Cout, WCo), 1) % Cout
    expand = (chan_e == lane_e).astype(jnp.float32)          # (Cout, W*Cout)

    def build_im2col(src, xcat_ref):
        """im2col along H with per-image zero padding, written into VMEM scratch.

        xcat[n*H + h, dy*WC + l] = src[n*H + h + dy - pad, l]  (0 outside image n)."""
        WC = src.shape[-1]
        xcat_ref[...] = jnp.zeros_like(xcat_ref)             # zero boundary taps once
        for dy in range(KH):                                  # KH=3, static
            sh = dy - pad
            if sh == 0:
                # centre tap: every row, one full-height write
                xcat_ref[pl.ds(0, N * H), pl.ds(dy * WC, WC)] = src
            else:
                rows = H - abs(sh)
                for n in range(N):                            # static, small N
                    d0 = n * H + max(0, -sh)
                    s0 = n * H + max(0, sh)
                    xcat_ref[pl.ds(d0, rows), pl.ds(dy * WC, WC)] = src[s0:s0 + rows, :]

    def conv(xcat_ref, m_ref):
        # ONE MXU matmul per block: bf16 operands, f32 accumulation.
        return jnp.dot(xcat_ref[...].astype(jnp.bfloat16), m_ref[...],
                       preferred_element_type=jnp.float32)    # (N*H, W*Cout) f32

    def bn_prelu(y, p):
        # y: (N*H, W*Cout) f32 ; p: (3, Cout) = [gamma, beta, prelu_slope]
        cnt = jnp.float32(N * H * W)
        s = jnp.sum(y, axis=0, keepdims=True)                 # (1, W*Cout)
        sq = jnp.sum(y * y, axis=0, keepdims=True)            # (1, W*Cout)
        ssq_c = jnp.dot(jnp.concatenate([s, sq], axis=0), fold,
                        preferred_element_type=jnp.float32)   # (2, Cout)
        mean = ssq_c[0:1, :] / cnt
        var = jnp.maximum(ssq_c[1:2, :] / cnt - mean * mean, 0.0)   # biased var, clamped
        gamma, beta, alpha = p[0:1, :], p[1:2, :], p[2:3, :]
        scale = gamma * lax.rsqrt(var + eps)
        shift = beta - mean * scale
        coef = jnp.dot(jnp.concatenate([scale, shift, alpha], axis=0), expand,
                       preferred_element_type=jnp.float32)    # (3, W*Cout)
        z = y * coef[0:1, :] + coef[1:2, :]
        return jnp.where(z >= 0.0, z, coef[2:3, :] * z)

    # ---- block 1: conv -> BN -> PReLU (activation stays in VMEM / vregs) ----
    build_im2col(x_ref[...], xcat1_ref)
    h1 = bn_prelu(conv(xcat1_ref, m1_ref), p1_ref[...])
    # ---- block 2 ----
    build_im2col(h1, xcat2_ref)
    o_ref[...] = bn_prelu(conv(xcat2_ref, m2_ref), p2_ref[...])


# ----------------------------------------------------------------------------
# Wrapper: banded + K-stacked weights, pallas_call, single layout change
# ----------------------------------------------------------------------------
def band_weight(w, W):
    """(KH, KW, Cin, Cout) 'same'-conv weight -> K-stacked banded matrix.

    M[dy*W*Cin + wp*Cin + ci, wq*Cout + co] = w[dy, wp - wq + KW//2, ci, co]  (0 outside band)
    so that  y = Xim2col @ M  with  Xim2col[:, dy*W*Cin + l] = x_hpad[h+dy, l]
    is the zero-padded KHxKW convolution with a lane-dense (W*Cout) output."""
    KH, KW, Cin, Cout = w.shape
    wp = jnp.arange(W)[:, None]
    wq = jnp.arange(W)[None, :]
    dx = wp - wq + KW // 2                                    # (W, W)
    valid = ((dx >= 0) & (dx < KW)).astype(w.dtype)
    taps = w[:, jnp.clip(dx, 0, KW - 1), :, :]                # (KH, W, W, Cin, Cout)
    taps = taps * valid[None, :, :, None, None]
    return jnp.transpose(taps, (0, 1, 3, 2, 4)).reshape(KH * W * Cin, W * Cout)


def conv_block2_fwd(x_nchw, params, eps=1e-5):
    """ConvBlock2 forward (NCHW in / NCHW out)."""
    N, Cin, H, W = x_nchw.shape
    KH, KW, _, Cout = params["w1"].shape

    # one layout change for the whole ConvBlock2: NCHW -> lane-dense (N*H, W*Cin)
    x2d = jnp.transpose(x_nchw.astype(jnp.float32), (0, 2, 3, 1)).reshape(N * H, W * Cin)
    # banded, K-stacked, bf16 conv weights (half-size HBM slabs; f32 accumulation in-kernel)
    m1 = band_weight(params["w1"].astype(jnp.float32), W).astype(jnp.bfloat16)  # (KH*W*Cin,  W*Cout)
    m2 = band_weight(params["w2"].astype(jnp.float32), W).astype(jnp.bfloat16)  # (KH*W*Cout, W*Cout)
    p1 = jnp.stack([params["gamma1"], params["beta1"],
                    jnp.broadcast_to(params["a1"], (Cout,))]).astype(jnp.float32)
    p2 = jnp.stack([params["gamma2"], params["beta2"],
                    jnp.broadcast_to(params["a2"], (Cout,))]).astype(jnp.float32)

    kernel = functools.partial(_conv_block2_kernel, N=N, H=H, W=W,
                               Cout=Cout, KH=KH, eps=eps)
    flops = (2 * (N * H) * (KH * W * Cin) * (W * Cout)
             + 2 * (N * H) * (KH * W * Cout) * (W * Cout))
    bytes_accessed = (4 * x2d.size + 2 * (m1.size + m2.size)
                      + 4 * (p1.size + p2.size) + 4 * N * H * W * Cout)

    out2d = pl.pallas_call(
        kernel,
        out_shape=jax.ShapeDtypeStruct((N * H, W * Cout), jnp.float32),
        grid=(1,),
        in_specs=[
            pl.BlockSpec((N * H, W * Cin), lambda i: (0, 0)),
            pl.BlockSpec((KH * W * Cin, W * Cout), lambda i: (0, 0)),
            pl.BlockSpec((KH * W * Cout, W * Cout), lambda i: (0, 0)),
            pl.BlockSpec((3, Cout), lambda i: (0, 0)),
            pl.BlockSpec((3, Cout), lambda i: (0, 0)),
        ],
        out_specs=pl.BlockSpec((N * H, W * Cout), lambda i: (0, 0)),
        scratch_shapes=[
            pltpu.VMEM((N * H, KH * W * Cin), jnp.float32),   # im2col slab, block 1
            pltpu.VMEM((N * H, KH * W * Cout), jnp.float32),  # im2col slab, block 2
        ],
        compiler_params=pltpu.CompilerParams(dimension_semantics=("arbitrary",)),
        cost_estimate=pl.CostEstimate(flops=flops, transcendentals=2 * Cout,
                                      bytes_accessed=bytes_accessed),
    )(x2d, m1, m2, p1, p2)

    # lane-dense (N*H, W*Cout) -> NCHW (keep NHWC/lane-dense end-to-end if the surrounding
    # model allows it; the transposes are the only wrapper-side activation passes).
    return jnp.transpose(out2d.reshape(N, H, W, Cout), (0, 3, 1, 2))


# ----------------------------------------------------------------------------
# Deterministic parameter init (ConvBlock2(in=4, out=8, k=3) shapes).
# ----------------------------------------------------------------------------
def init_params(key, cin, cout, k=3):
    k1, k2 = jax.random.split(key, 2)
    return {
        # conv weights in (KH, KW, Cin, Cout) layout (= torch_weight.permute(2,3,1,0)), no bias
        "w1": jax.random.normal(k1, (k, k, cin, cout), jnp.float32) / jnp.sqrt(cin * k * k),
        "w2": jax.random.normal(k2, (k, k, cout, cout), jnp.float32) / jnp.sqrt(cout * k * k),
        # BatchNorm2d default affine init
        "gamma1": jnp.ones((cout,), jnp.float32), "beta1": jnp.zeros((cout,), jnp.float32),
        "gamma2": jnp.ones((cout,), jnp.float32), "beta2": jnp.zeros((cout,), jnp.float32),
        # PReLU default single shared slope 0.25
        "a1": jnp.float32(0.25), "a2": jnp.float32(0.25),
    }


# ----------------------------------------------------------------------------
# Pure-JAX f32 reference (same train-mode BN semantics) for a sanity check.
# ----------------------------------------------------------------------------
def _reference_fwd(x_nchw, params, eps=1e-5):
    def block(x, w, gamma, beta, a):
        wt = jnp.transpose(w, (3, 2, 0, 1))                   # OIHW
        y = lax.conv_general_dilated(x, wt, (1, 1), ((1, 1), (1, 1)),
                                     dimension_numbers=("NCHW", "OIHW", "NCHW"),
                                     precision=lax.Precision.HIGHEST)
        mean = jnp.mean(y, axis=(0, 2, 3), keepdims=True)
        var = jnp.mean(jnp.square(y - mean), axis=(0, 2, 3), keepdims=True)
        z = (y - mean) * lax.rsqrt(var + eps) * gamma[None, :, None, None] \
            + beta[None, :, None, None]
        return jnp.where(z >= 0, z, a * z)

    h = block(x_nchw.astype(jnp.float32), params["w1"],
              params["gamma1"], params["beta1"], params["a1"])
    return block(h, params["w2"], params["gamma2"], params["beta2"], params["a2"])


if __name__ == "__main__":
    N, Cin, Cout, H, W = 2, 4, 8, 16, 16
    key = jax.random.PRNGKey(0)
    kx, kp = jax.random.split(key)
    x = jax.random.normal(kx, (N, Cin, H, W), jnp.float32)    # NCHW, like the PyTorch module
    params = init_params(kp, Cin, Cout)

    out = jax.jit(conv_block2_fwd)(x, params)
    jax.block_until_ready(out)
    assert out.shape == (N, Cout, H, W)

    # bf16 MXU operands (f32 accumulation) vs f32 reference: comfortably inside 5e-2.
    ref = _reference_fwd(x, params)
    assert bool(jnp.allclose(out, ref, rtol=5e-2, atol=5e-2)), \
        float(jnp.max(jnp.abs(out - ref)))
    print("KERNEL_OK")
</pallas_src>

<mosaic_0001>
module attributes {stable_mosaic.version = 11 : i64} {
  func.func @_conv_block2_kernel(%arg0: i32, %arg1: memref<32x64xf32, #tpu.memory_space<vmem>>, %arg2: memref<192x128xbf16, #tpu.memory_space<vmem>>, %arg3: memref<384x128xbf16, #tpu.memory_space<vmem>>, %arg4: memref<3x8xf32, #tpu.memory_space<vmem>>, %arg5: memref<3x8xf32, #tpu.memory_space<vmem>>, %arg6: memref<32x128xf32, #tpu.memory_space<vmem>>, %arg7: memref<32x192xf32, #tpu.memory_space<vmem>>, %arg8: memref<32x384xf32, #tpu.memory_space<vmem>>) attributes {dimension_semantics = [#tpu.dimension_semantics<arbitrary>], iteration_bounds = array<i64: 1>, scalar_prefetch = 0 : i64, scratch_operands = 2 : i64, tpu.core_type = #tpu.core_type<tc>, window_params = [{pipeline_mode = #tpu.pipeline_mode<synchronous>, transform_indices = @transform_0, window_bounds = array<i64: 32, 64>}, {pipeline_mode = #tpu.pipeline_mode<synchronous>, transform_indices = @transform_1, window_bounds = array<i64: 192, 128>}, {pipeline_mode = #tpu.pipeline_mode<synchronous>, transform_indices = @transform_2, window_bounds = array<i64: 384, 128>}, {pipeline_mode = #tpu.pipeline_mode<synchronous>, transform_indices = @transform_3, window_bounds = array<i64: 3, 8>}, {pipeline_mode = #tpu.pipeline_mode<synchronous>, transform_indices = @transform_4, window_bounds = array<i64: 3, 8>}, {pipeline_mode = #tpu.pipeline_mode<synchronous>, transform_indices = @transform_5, window_bounds = array<i64: 32, 128>}]} {
    %0 = tpu.iota {dimensions = array<i32: 0>} : vector<128x8xi32>
    %c8_i32 = arith.constant 8 : i32
    %c0_i32 = arith.constant 0 : i32
    %1 = arith.cmpi eq, %c8_i32, %c0_i32 : i32
    %c1_i32 = arith.constant 1 : i32
    %2 = arith.select %1, %c1_i32, %c8_i32 : i32
    %3 = vector.broadcast %2 : i32 to vector<128x8xi32>
    %4 = arith.remsi %0, %3 : vector<128x8xi32>
    %c0_i32_0 = arith.constant 0 : i32
    %5 = vector.broadcast %c0_i32_0 : i32 to vector<128x8xi32>
    %6 = arith.cmpi ne, %4, %5 : vector<128x8xi32>
    %c0_i32_1 = arith.constant 0 : i32
    %7 = vector.broadcast %c0_i32_1 : i32 to vector<128x8xi32>
    %8 = arith.cmpi slt, %4, %7 : vector<128x8xi32>
    %c0_i32_2 = arith.constant 0 : i32
    %9 = arith.cmpi slt, %2, %c0_i32_2 : i32
    %10 = vector.broadcast %9 : i1 to vector<128x8xi1>
    %11 = vector.broadcast %10 : vector<128x8xi1> to vector<128x8xi1>
    %12 = arith.xori %8, %11 : vector<128x8xi1>
    %13 = arith.andi %12, %6 : vector<128x8xi1>
    %14 = vector.broadcast %2 : i32 to vector<128x8xi32>
    %15 = arith.addi %4, %14 : vector<128x8xi32>
    %16 = arith.select %13, %15, %4 : vector<128x8xi1>, vector<128x8xi32>
    %17 = tpu.iota {dimensions = array<i32: 1>} : vector<128x8xi32>
    %18 = arith.cmpi eq, %16, %17 : vector<128x8xi32>
    %19 = arith.extui %18 : vector<128x8xi1> to vector<128x8xi32>
    %20 = arith.sitofp %19 : vector<128x8xi32> to vector<128x8xf32>
    %21 = tpu.iota {dimensions = array<i32: 0>} : vector<8x128xi32>
    %22 = tpu.iota {dimensions = array<i32: 1>} : vector<8x128xi32>
    %c8_i32_3 = arith.constant 8 : i32
    %c0_i32_4 = arith.constant 0 : i32
    %23 = arith.cmpi eq, %c8_i32_3, %c0_i32_4 : i32
    %c1_i32_5 = arith.constant 1 : i32
    %24 = arith.select %23, %c1_i32_5, %c8_i32_3 : i32
    %25 = vector.broadcast %24 : i32 to vector<8x128xi32>
    %26 = arith.remsi %22, %25 : vector<8x128xi32>
    %c0_i32_6 = arith.constant 0 : i32
    %27 = vector.broadcast %c0_i32_6 : i32 to vector<8x128xi32>
    %28 = arith.cmpi ne, %26, %27 : vector<8x128xi32>
    %c0_i32_7 = arith.constant 0 : i32
    %29 = vector.broadcast %c0_i32_7 : i32 to vector<8x128xi32>
    %30 = arith.cmpi slt, %26, %29 : vector<8x128xi32>
    %c0_i32_8 = arith.constant 0 : i32
    %31 = arith.cmpi slt, %24, %c0_i32_8 : i32
    %32 = vector.broadcast %31 : i1 to vector<8x128xi1>
    %33 = vector.broadcast %32 : vector<8x128xi1> to vector<8x128xi1>
    %34 = arith.xori %30, %33 : vector<8x128xi1>
    %35 = arith.andi %34, %28 : vector<8x128xi1>
    %36 = vector.broadcast %24 : i32 to vector<8x128xi32>
    %37 = arith.addi %26, %36 : vector<8x128xi32>
    %38 = arith.select %35, %37, %26 : vector<8x128xi1>, vector<8x128xi32>
    %39 = arith.cmpi eq, %21, %38 : vector<8x128xi32>
    %40 = arith.extui %39 : vector<8x128xi1> to vector<8x128xi32>
    %41 = arith.sitofp %40 : vector<8x128xi32> to vector<8x128xf32>
    %c0 = arith.constant 0 : index
    %c0_9 = arith.constant 0 : index
    %42 = vector.load %arg1[%c0, %c0_9] : memref<32x64xf32, #tpu.memory_space<vmem>>, vector<32x64xf32>
    %cst = arith.constant 0.000000e+00 : f32
    %43 = vector.broadcast %cst : f32 to vector<32x192xf32>
    %c0_10 = arith.constant 0 : index
    %c0_11 = arith.constant 0 : index
    %44 = vector.load %arg7[%c0_10, %c0_11] : memref<32x192xf32, #tpu.memory_space<vmem>>, vector<32x192xf32>
    tpu.vector_store %arg7[%c0_10, %c0_11], %43 {strides = array<i32>} : memref<32x192xf32, #tpu.memory_space<vmem>>, vector<32x192xf32>,
    %45 = vector.extract_strided_slice %42 {offsets = [0, 0], sizes = [15, 64], strides = [1, 1]} : vector<32x64xf32> to vector<15x64xf32>
    %c1 = arith.constant 1 : index
    %c0_12 = arith.constant 0 : index
    %46 = vector.load %arg7[%c1, %c0_12] : memref<32x192xf32, #tpu.memory_space<vmem>>, vector<15x64xf32>
    tpu.vector_store %arg7[%c1, %c0_12], %45 {strides = array<i32>} : memref<32x192xf32, #tpu.memory_space<vmem>>, vector<15x64xf32>,
    %47 = vector.extract_strided_slice %42 {offsets = [16, 0], sizes = [15, 64], strides = [1, 1]} : vector<32x64xf32> to vector<15x64xf32>
    %c17 = arith.constant 17 : index
    %c0_13 = arith.constant 0 : index
    %48 = vector.load %arg7[%c17, %c0_13] : memref<32x192xf32, #tpu.memory_space<vmem>>, vector<15x64xf32>
    tpu.vector_store %arg7[%c17, %c0_13], %47 {strides = array<i32>} : memref<32x192xf32, #tpu.memory_space<vmem>>, vector<15x64xf32>,
    %c0_14 = arith.constant 0 : index
    %c64 = arith.constant 64 : index
    %49 = vector.load %arg7[%c0_14, %c64] : memref<32x192xf32, #tpu.memory_space<vmem>>, vector<32x64xf32>
    tpu.vector_store %arg7[%c0_14, %c64], %42 {strides = array<i32>} : memref<32x192xf32, #tpu.memory_space<vmem>>, vector<32x64xf32>,
    %50 = vector.extract_strided_slice %42 {offsets = [1, 0], sizes = [15, 64], strides = [1, 1]} : vector<32x64xf32> to vector<15x64xf32>
    %c0_15 = arith.constant 0 : index
    %c128 = arith.constant 128 : index
    %51 = vector.load %arg7[%c0_15, %c128] : memref<32x192xf32, #tpu.memory_space<vmem>>, vector<15x64xf32>
    tpu.vector_store %arg7[%c0_15, %c128], %50 {strides = array<i32>} : memref<32x192xf32, #tpu.memory_space<vmem>>, vector<15x64xf32>,
    %52 = vector.extract_strided_slice %42 {offsets = [17, 0], sizes = [15, 64], strides = [1, 1]} : vector<32x64xf32> to vector<15x64xf32>
    %c16 = arith.constant 16 : index
    %c128_16 = arith.constant 128 : index
    %53 = vector.load %arg7[%c16, %c128_16] : memref<32x192xf32, #tpu.memory_space<vmem>>, vector<15x64xf32>
    tpu.vector_store %arg7[%c16, %c128_16], %52 {strides = array<i32>} : memref<32x192xf32, #tpu.memory_space<vmem>>, vector<15x64xf32>,
    %c0_17 = arith.constant 0 : index
    %c0_18 = arith.constant 0 : index
    %54 = vector.load %arg7[%c0_17, %c0_18] : memref<32x192xf32, #tpu.memory_space<vmem>>, vector<32x192xf32>
    %55 = arith.truncf %54 : vector<32x192xf32> to vector<32x192xbf16>
    %c0_19 = arith.constant 0 : index
    %c0_20 = arith.constant 0 : index
    %56 = vector.load %arg2[%c0_19, %c0_20] : memref<192x128xbf16, #tpu.memory_space<vmem>>, vector<192x128xbf16>
    %cst_21 = arith.constant dense<0.000000e+00> : vector<32x128xf32>
    %57 = tpu.matmul %55, %56, %cst_21 {dimension_numbers = #tpu.dot_dimension_numbers<[1], [0], [0], [1], [0, 0, 1, 1], [], []>} : vector<32x192xbf16>, vector<192x128xbf16>, vector<32x128xf32> -> vector<32x128xf32>
    %c0_22 = arith.constant 0 : index
    %c0_23 = arith.constant 0 : index
    %58 = vector.load %arg4[%c0_22, %c0_23] : memref<3x8xf32, #tpu.memory_space<vmem>>, vector<3x8xf32>
    %cst_24 = arith.constant dense<0.000000e+00> : vector<128xf32>
    %59 = vector.multi_reduction <add>, %57, %cst_24 [0] : vector<32x128xf32> to vector<128xf32>
    %60 = vector.shape_cast %59 : vector<128xf32> to vector<1x128xf32>
    %61 = arith.mulf %57, %57 : vector<32x128xf32>
    %cst_25 = arith.constant dense<0.000000e+00> : vector<128xf32>
    %62 = vector.multi_reduction <add>, %61, %cst_25 [0] : vector<32x128xf32> to vector<128xf32>
    %63 = vector.shape_cast %62 : vector<128xf32> to vector<1x128xf32>
    %64 = tpu.concatenate %60, %63 in 0 : vector<1x128xf32>, vector<1x128xf32> -> vector<2x128xf32>
    %cst_26 = arith.constant dense<0.000000e+00> : vector<2x8xf32>
    %65 = tpu.matmul %64, %20, %cst_26 {dimension_numbers = #tpu.dot_dimension_numbers<[1], [0], [0], [1], [0, 0, 1, 1], [], []>} : vector<2x128xf32>, vector<128x8xf32>, vector<2x8xf32> -> vector<2x8xf32>
    %66 = vector.extract_strided_slice %65 {offsets = [0, 0], sizes = [1, 8], strides = [1, 1]} : vector<2x8xf32> to vector<1x8xf32>
    %cst_27 = arith.constant 5.120000e+02 : f32
    %67 = vector.broadcast %cst_27 : f32 to vector<1x8xf32>
    %68 = arith.divf %66, %67 : vector<1x8xf32>
    %69 = vector.extract_strided_slice %65 {offsets = [1, 0], sizes = [1, 8], strides = [1, 1]} : vector<2x8xf32> to vector<1x8xf32>
    %cst_28 = arith.constant 5.120000e+02 : f32
    %70 = vector.broadcast %cst_28 : f32 to vector<1x8xf32>
    %71 = arith.divf %69, %70 : vector<1x8xf32>
    %72 = arith.mulf %68, %68 : vector<1x8xf32>
    %73 = arith.subf %71, %72 : vector<1x8xf32>
    %cst_29 = arith.constant 0.000000e+00 : f32
    %74 = vector.broadcast %cst_29 : f32 to vector<1x8xf32>
    %75 = arith.maximumf %73, %74 : vector<1x8xf32>
    %76 = vector.extract_strided_slice %58 {offsets = [0, 0], sizes = [1, 8], strides = [1, 1]} : vector<3x8xf32> to vector<1x8xf32>
    %77 = vector.extract_strided_slice %58 {offsets = [1, 0], sizes = [1, 8], strides = [1, 1]} : vector<3x8xf32> to vector<1x8xf32>
    %78 = vector.extract_strided_slice %58 {offsets = [2, 0], sizes = [1, 8], strides = [1, 1]} : vector<3x8xf32> to vector<1x8xf32>
    %cst_30 = arith.constant 9.99999974E-6 : f32
    %79 = vector.broadcast %cst_30 : f32 to vector<1x8xf32>
    %80 = arith.addf %75, %79 : vector<1x8xf32>
    %81 = math.rsqrt %80 : vector<1x8xf32>
    %82 = arith.mulf %76, %81 : vector<1x8xf32>
    %83 = arith.mulf %68, %82 : vector<1x8xf32>
    %84 = arith.subf %77, %83 : vector<1x8xf32>
    %85 = tpu.concatenate %82, %84, %78 in 0 : vector<1x8xf32>, vector<1x8xf32>, vector<1x8xf32> -> vector<3x8xf32>
    %cst_31 = arith.constant dense<0.000000e+00> : vector<3x128xf32>
    %86 = tpu.matmul %85, %41, %cst_31 {dimension_numbers = #tpu.dot_dimension_numbers<[1], [0], [0], [1], [0, 0, 1, 1], [], []>} : vector<3x8xf32>, vector<8x128xf32>, vector<3x128xf32> -> vector<3x128xf32>
    %87 = vector.extract_strided_slice %86 {offsets = [0, 0], sizes = [1, 128], strides = [1, 1]} : vector<3x128xf32> to vector<1x128xf32>
    %88 = vector.broadcast %87 : vector<1x128xf32> to vector<32x128xf32>
    %89 = arith.mulf %57, %88 : vector<32x128xf32>
    %90 = vector.extract_strided_slice %86 {offsets = [1, 0], sizes = [1, 128], strides = [1, 1]} : vector<3x128xf32> to vector<1x128xf32>
    %91 = vector.broadcast %90 : vector<1x128xf32> to vector<32x128xf32>
    %92 = arith.addf %89, %91 : vector<32x128xf32>
    %cst_32 = arith.constant 0.000000e+00 : f32
    %93 = vector.broadcast %cst_32 : f32 to vector<32x128xf32>
    %94 = arith.cmpf oge, %92, %93 : vector<32x128xf32>
    %95 = vector.extract_strided_slice %86 {offsets = [2, 0], sizes = [1, 128], strides = [1, 1]} : vector<3x128xf32> to vector<1x128xf32>
    %96 = vector.broadcast %95 : vector<1x128xf32> to vector<32x128xf32>
    %97 = arith.mulf %96, %92 : vector<32x128xf32>
    %98 = arith.select %94, %92, %97 : vector<32x128xi1>, vector<32x128xf32>
    %cst_33 = arith.constant 0.000000e+00 : f32
    %99 = vector.broadcast %cst_33 : f32 to vector<32x384xf32>
    %c0_34 = arith.constant 0 : index
    %c0_35 = arith.constant 0 : index
    %100 = vector.load %arg8[%c0_34, %c0_35] : memref<32x384xf32, #tpu.memory_space<vmem>>, vector<32x384xf32>
    tpu.vector_store %arg8[%c0_34, %c0_35], %99 {strides = array<i32>} : memref<32x384xf32, #tpu.memory_space<vmem>>, vector<32x384xf32>,
    %101 = vector.extract_strided_slice %98 {offsets = [0, 0], sizes = [15, 128], strides = [1, 1]} : vector<32x128xf32> to vector<15x128xf32>
    %c1_36 = arith.constant 1 : index
    %c0_37 = arith.constant 0 : index
    %102 = vector.load %arg8[%c1_36, %c0_37] : memref<32x384xf32, #tpu.memory_space<vmem>>, vector<15x128xf32>
    tpu.vector_store %arg8[%c1_36, %c0_37], %101 {strides = array<i32>} : memref<32x384xf32, #tpu.memory_space<vmem>>, vector<15x128xf32>,
    %103 = vector.extract_strided_slice %98 {offsets = [16, 0], sizes = [15, 128], strides = [1, 1]} : vector<32x128xf32> to vector<15x128xf32>
    %c17_38 = arith.constant 17 : index
    %c0_39 = arith.constant 0 : index
    %104 = vector.load %arg8[%c17_38, %c0_39] : memref<32x384xf32, #tpu.memory_space<vmem>>, vector<15x128xf32>
    tpu.vector_store %arg8[%c17_38, %c0_39], %103 {strides = array<i32>} : memref<32x384xf32, #tpu.memory_space<vmem>>, vector<15x128xf32>,
    %c0_40 = arith.constant 0 : index
    %c128_41 = arith.constant 128 : index
    %105 = vector.load %arg8[%c0_40, %c128_41] : memref<32x384xf32, #tpu.memory_space<vmem>>, vector<32x128xf32>
    tpu.vector_store %arg8[%c0_40, %c128_41], %98 {strides = array<i32>} : memref<32x384xf32, #tpu.memory_space<vmem>>, vector<32x128xf32>,
    %106 = vector.extract_strided_slice %98 {offsets = [1, 0], sizes = [15, 128], strides = [1, 1]} : vector<32x128xf32> to vector<15x128xf32>
    %c0_42 = arith.constant 0 : index
    %c256 = arith.constant 256 : index
    %107 = vector.load %arg8[%c0_42, %c256] : memref<32x384xf32, #tpu.memory_space<vmem>>, vector<15x128xf32>
    tpu.vector_store %arg8[%c0_42, %c256], %106 {strides = array<i32>} : memref<32x384xf32, #tpu.memory_space<vmem>>, vector<15x128xf32>,
    %108 = vector.extract_strided_slice %98 {offsets = [17, 0], sizes = [15, 128], strides = [1, 1]} : vector<32x128xf32> to vector<15x128xf32>
    %c16_43 = arith.constant 16 : index
    %c256_44 = arith.constant 256 : index
    %109 = vector.load %arg8[%c16_43, %c256_44] : memref<32x384xf32, #tpu.memory_space<vmem>>, vector<15x128xf32>
    tpu.vector_store %arg8[%c16_43, %c256_44], %108 {strides = array<i32>} : memref<32x384xf32, #tpu.memory_space<vmem>>, vector<15x128xf32>,
    %c0_45 = arith.constant 0 : index
    %c0_46 = arith.constant 0 : index
    %110 = vector.load %arg8[%c0_45, %c0_46] : memref<32x384xf32, #tpu.memory_space<vmem>>, vector<32x384xf32>
    %111 = arith.truncf %110 : vector<32x384xf32> to vector<32x384xbf16>
    %c0_47 = arith.constant 0 : index
    %c0_48 = arith.constant 0 : index
    %112 = vector.load %arg3[%c0_47, %c0_48] : memref<384x128xbf16, #tpu.memory_space<vmem>>, vector<384x128xbf16>
    %cst_49 = arith.constant dense<0.000000e+00> : vector<32x128xf32>
    %113 = tpu.matmul %111, %112, %cst_49 {dimension_numbers = #tpu.dot_dimension_numbers<[1], [0], [0], [1], [0, 0, 1, 1], [], []>} : vector<32x384xbf16>, vector<384x128xbf16>, vector<32x128xf32> -> vector<32x128xf32>
    %c0_50 = arith.constant 0 : index
    %c0_51 = arith.constant 0 : index
    %114 = vector.load %arg5[%c0_50, %c0_51] : memref<3x8xf32, #tpu.memory_space<vmem>>, vector<3x8xf32>
    %cst_52 = arith.constant dense<0.000000e+00> : vector<128xf32>
    %115 = vector.multi_reduction <add>, %113, %cst_52 [0] : vector<32x128xf32> to vector<128xf32>
    %116 = vector.shape_cast %115 : vector<128xf32> to vector<1x128xf32>
    %117 = arith.mulf %113, %113 : vector<32x128xf32>
    %cst_53 = arith.constant dense<0.000000e+00> : vector<128xf32>
    %118 = vector.multi_reduction <add>, %117, %cst_53 [0] : vector<32x128xf32> to vector<128xf32>
    %119 = vector.shape_cast %118 : vector<128xf32> to vector<1x128xf32>
    %120 = tpu.concatenate %116, %119 in 0 : vector<1x128xf32>, vector<1x128xf32> -> vector<2x128xf32>
    %cst_54 = arith.constant dense<0.000000e+00> : vector<2x8xf32>
    %121 = tpu.matmul %120, %20, %cst_54 {dimension_numbers = #tpu.dot_dimension_numbers<[1], [0], [0], [1], [0, 0, 1, 1], [], []>} : vector<2x128xf32>, vector<128x8xf32>, vector<2x8xf32> -> vector<2x8xf32>
    %122 = vector.extract_strided_slice %121 {offsets = [0, 0], sizes = [1, 8], strides = [1, 1]} : vector<2x8xf32> to vector<1x8xf32>
    %cst_55 = arith.constant 5.120000e+02 : f32
    %123 = vector.broadcast %cst_55 : f32 to vector<1x8xf32>
    %124 = arith.divf %122, %123 : vector<1x8xf32>
    %125 = vector.extract_strided_slice %121 {offsets = [1, 0], sizes = [1, 8], strides = [1, 1]} : vector<2x8xf32> to vector<1x8xf32>
    %cst_56 = arith.constant 5.120000e+02 : f32
    %126 = vector.broadcast %cst_56 : f32 to vector<1x8xf32>
    %127 = arith.divf %125, %126 : vector<1x8xf32>
    %128 = arith.mulf %124, %124 : vector<1x8xf32>
    %129 = arith.subf %127, %128 : vector<1x8xf32>
    %cst_57 = arith.constant 0.000000e+00 : f32
    %130 = vector.broadcast %cst_57 : f32 to vector<1x8xf32>
    %131 = arith.maximumf %129, %130 : vector<1x8xf32>
    %132 = vector.extract_strided_slice %114 {offsets = [0, 0], sizes = [1, 8], strides = [1, 1]} : vector<3x8xf32> to vector<1x8xf32>
    %133 = vector.extract_strided_slice %114 {offsets = [1, 0], sizes = [1, 8], strides = [1, 1]} : vector<3x8xf32> to vector<1x8xf32>
    %134 = vector.extract_strided_slice %114 {offsets = [2, 0], sizes = [1, 8], strides = [1, 1]} : vector<3x8xf32> to vector<1x8xf32>
    %cst_58 = arith.constant 9.99999974E-6 : f32
    %135 = vector.broadcast %cst_58 : f32 to vector<1x8xf32>
    %136 = arith.addf %131, %135 : vector<1x8xf32>
    %137 = math.rsqrt %136 : vector<1x8xf32>
    %138 = arith.mulf %132, %137 : vector<1x8xf32>
    %139 = arith.mulf %124, %138 : vector<1x8xf32>
    %140 = arith.subf %133, %139 : vector<1x8xf32>
    %141 = tpu.concatenate %138, %140, %134 in 0 : vector<1x8xf32>, vector<1x8xf32>, vector<1x8xf32> -> vector<3x8xf32>
    %cst_59 = arith.constant dense<0.000000e+00> : vector<3x128xf32>
    %142 = tpu.matmul %141, %41, %cst_59 {dimension_numbers = #tpu.dot_dimension_numbers<[1], [0], [0], [1], [0, 0, 1, 1], [], []>} : vector<3x8xf32>, vector<8x128xf32>, vector<3x128xf32> -> vector<3x128xf32>
    %143 = vector.extract_strided_slice %142 {offsets = [0, 0], sizes = [1, 128], strides = [1, 1]} : vector<3x128xf32> to vector<1x128xf32>
    %144 = vector.broadcast %143 : vector<1x128xf32> to vector<32x128xf32>
    %145 = arith.mulf %113, %144 : vector<32x128xf32>
    %146 = vector.extract_strided_slice %142 {offsets = [1, 0], sizes = [1, 128], strides = [1, 1]} : vector<3x128xf32> to vector<1x128xf32>
    %147 = vector.broadcast %146 : vector<1x128xf32> to vector<32x128xf32>
    %148 = arith.addf %145, %147 : vector<32x128xf32>
    %cst_60 = arith.constant 0.000000e+00 : f32
    %149 = vector.broadcast %cst_60 : f32 to vector<32x128xf32>
    %150 = arith.cmpf oge, %148, %149 : vector<32x128xf32>
    %151 = vector.extract_strided_slice %142 {offsets = [2, 0], sizes = [1, 128], strides = [1, 1]} : vector<3x128xf32> to vector<1x128xf32>
    %152 = vector.broadcast %151 : vector<1x128xf32> to vector<32x128xf32>
    %153 = arith.mulf %152, %148 : vector<32x128xf32>
    %154 = arith.select %150, %148, %153 : vector<32x128xi1>, vector<32x128xf32>
    %c0_61 = arith.constant 0 : index
    %c0_62 = arith.constant 0 : index
    %155 = vector.load %arg6[%c0_61, %c0_62] : memref<32x128xf32, #tpu.memory_space<vmem>>, vector<32x128xf32>
    tpu.vector_store %arg6[%c0_61, %c0_62], %154 {strides = array<i32>} : memref<32x128xf32, #tpu.memory_space<vmem>>, vector<32x128xf32>,
    return
  }
  func.func @transform_0(%arg0: i32) -> (i32, i32) {
    %c0_i32 = arith.constant 0 : i32
    %c0_i32_0 = arith.constant 0 : i32
    %c0_i32_1 = arith.constant 0 : i32
    return %c0_i32, %c0_i32_0 : i32, i32
  }
  func.func @transform_1(%arg0: i32) -> (i32, i32) {
    %c0_i32 = arith.constant 0 : i32
    %c0_i32_0 = arith.constant 0 : i32
    %c0_i32_1 = arith.constant 0 : i32
    return %c0_i32, %c0_i32_0 : i32, i32
  }
  func.func @transform_2(%arg0: i32) -> (i32, i32) {
    %c0_i32 = arith.constant 0 : i32
    %c0_i32_0 = arith.constant 0 : i32
    %c0_i32_1 = arith.constant 0 : i32
    return %c0_i32, %c0_i32_0 : i32, i32
  }
  func.func @transform_3(%arg0: i32) -> (i32, i32) {
    %c0_i32 = arith.constant 0 : i32
    %c0_i32_0 = arith.constant 0 : i32
    %c0_i32_1 = arith.constant 0 : i32
    return %c0_i32, %c0_i32_0 : i32, i32
  }
  func.func @transform_4(%arg0: i32) -> (i32, i32) {
    %c0_i32 = arith.constant 0 : i32
    %c0_i32_0 = arith.constant 0 : i32
    %c0_i32_1 = arith.constant 0 : i32
    return %c0_i32, %c0_i32_0 : i32, i32
  }
  func.func @transform_5(%arg0: i32) -> (i32, i32) {
    %c0_i32 = arith.constant 0 : i32
    %c0_i32_0 = arith.constant 0 : i32
    %c0_i32_1 = arith.constant 0 : i32
    return %c0_i32, %c0_i32_0 : i32, i32
  }
}

</mosaic_0001>

<bundles_post_ra>
// kernel: conv_block2_fwd.1
= control target key start
LH: loop header
LB: loop body
LE: loop exit
PB: predicated region body
PF: predicated region fallthrough
CT: control target
= control target key end

     0   :  { %vm300_vm0 = vcmask 523264   ;;  %vm2236_vm1 = vcmask 1046528   ;;  %v1691_v3 = vmov 0.0   ;;  %vm352_vm2 = vcmask 522240   ;;  %s1692_s24 = smov 64   ;;  %s2225_s0 = inlined_call_operand.vmem [shape: f32[32,64], index: 0, kind: input, shape index: {}]   ;;  %s2226_s1 = inlined_call_operand.vmem [shape: bf16[192,128], index: 1, kind: input, shape index: {}]   ;;  %s2227_s2 = inlined_call_operand.vmem [shape: bf16[384,128], index: 2, kind: input, shape index: {}]   ;;  %s2228_s3 = inlined_call_operand.vmem [shape: f32[3,8], index: 3, kind: input, shape index: {}]   ;;  %s2229_s4 = inlined_call_operand.vmem [shape: f32[3,8], index: 4, kind: input, shape index: {}]   ;;  %s2230_s5 = inlined_call_operand.vmem [shape: f32[32,128], index: 5, kind: output, shape index: {}]  }
   0x1   :  { %v295_v0 = vld [vmem:[%s2225_s0] sm:$0xff]  ;;  %v297_v1 = vld [vmem:[%s2225_s0 + $0x10] sm:$0xff]  ;;  %v296_v2 = vld [vmem:[%s2225_s0 + $0x8] sm:$0xff]  ;;  %301 = vst.msk [vmem:[#allocation2 + $0x8] sm:$0xff] %vm300_vm0, %v1691_v3  ;;  %vm316_vm3 = vcmask 523265   ;;  %v1693_v14 = vmov 0   ;;  %v21_v21 = vlaneseq }
   0x2   :  { %303 = vst.msk [vmem:[#allocation2 + $0x18] sm:$0xff] %vm300_vm0, %v1691_v3  ;;  %299 = vst [vmem:[#allocation2] sm:$0xff] %v1691_v3  ;;  %328 = vrot.lane.b32.xlu0 %v295_v0, %s1692_s24  ;;  %v311_v4 = vrot.slane %v295_v0, 7  ;;  %v346_v5 = vrot.slane %v295_v0, 1  ;;  %332 = vrot.lane.b32.xlu1 %v297_v1, %s1692_s24  ;;  %v321_v6 = vrot.slane %v297_v1, 7  ;;  %v354_v7 = vrot.slane %v297_v1, 1 }
   0x3   :  { %302 = vst [vmem:[#allocation2 + $0x10] sm:$0xff] %v1691_v3  ;;  %304 = vst [vmem:[#allocation2 + $0x20] sm:$0xff] %v1691_v3  ;;  %v298_v8 = vld [vmem:[%s2225_s0 + $0x18] sm:$0xff]  ;;  %v1651_v9 = vld [vmem:[%s2226_s1] sm:$0xff]   ;;  %v312_v10 = vrot.slane %v296_v2, 7  ;;  %v347_v11 = vrot.slane %v296_v2, 1  ;;  %475 = vmatprep.subr.bf16.mxu0 %v1693_v14 }
   0x4   :  { %305 = vst.msk [vmem:[#allocation2 + $0x28] sm:$0xff] %vm300_vm0, %v1691_v3  ;;  %306 = vst [vmem:[#allocation2 + $0x30] sm:$0xff] %v1691_v3  ;;  %v322_v12 = vrot.slane %v298_v8, 7  ;;  %v355_v13 = vrot.slane %v298_v8, 1  ;;  %476 = vmatpush1.bf16.msra.mxu0 %v1651_v9  ;;  %v1652_v17 = vld [vmem:[%s2226_s1 + $0x8] sm:$0xff]   ;;  %vm2238_vm4 = vcmask 1040384  }
   0x5   :  { %307 = vst.msk [vmem:[#allocation2 + $0x38] sm:$0xff] %vm300_vm0, %v1691_v3  ;;  %746 = vst [vmem:[#allocation3] sm:$0xff] %v1691_v3  ;;  %v348_v15 = vsel %vm2236_vm1, %v346_v5, %v347_v11  ;;  %477 = vmatprep.subr.bf16.mxu0 %v1693_v14  ;;  %v313_v18 = vsel %vm2238_vm4, %v311_v4, %v312_v10  ;;  %v1653_v20 = vld [vmem:[%s2226_s1 + $0x10] sm:$0xff]   ;;  %v1654_v22 = vld [vmem:[%s2226_s1 + $0x18] sm:$0xff]   ;;  %v1694_v23 = vmov 0.0|0.0   ;;  %v1785_v24 = vshrl.u32 %v21_v21, 7 }
   0x6   :  { %751 = vst [vmem:[#allocation3 + $0x28] sm:$0xff] %v1691_v3  ;;  %752 = vst [vmem:[#allocation3 + $0x30] sm:$0xff] %v1691_v3  ;;  %v356_v16 = vsel %vm2236_vm1, %v354_v7, %v355_v13  ;;  %330 = vrot.lane.b32.xlu0 %v296_v2, %s1692_s24  ;;  %334 = vrot.lane.b32.xlu1 %v298_v8, %s1692_s24  ;;  %v323_v19 = vsel %vm2238_vm4, %v321_v6, %v322_v12  ;;  %v1787_v25 = vand.u32 127, %v21_v21  ;;  %v1655_v29 = vld [vmem:[%s2226_s1 + $0x20] sm:$0xff]   ;;  %v1656_v35 = vld [vmem:[%s2226_s1 + $0x28] sm:$0xff]   ;;  %vm340_vm8 = vcmask 1048064  }
   0x7   :  { %757 = vst [vmem:[#allocation3 + $0x58] sm:$0xff] %v1691_v3  ;;  %317 = vst.msk [vmem:[#allocation2] sm:$0xfe] %vm316_vm3, %v311_v4  ;;  %1596 = vmatprep.subr.bf16.mxu1 %v1694_v23  ;;  %v23_v27 = vadd.s32 8, %v1785_v24  ;;  %v42_v28 = vand.u32 7, %v1785_v24  ;;  %v1657_v37 = vld [vmem:[%s2226_s1 + $0x30] sm:$0xff]  }
   0x8   :  { %326 = vst.msk [vmem:[#allocation2 + $0x20] sm:$0xfe] %vm316_vm3, %v321_v6  ;;  %478 = vmatpush1.bf16.msra.mxu0 %v1652_v17  ;;  %v1695_v36 = vmov 1.0|1.0   ;;  %v1658_v38 = vld [vmem:[%s2226_s1 + $0x38] sm:$0xff]   ;;  %v1659_v39 = vld [vmem:[%s2226_s1 + $0x40] sm:$0xff]  }
   0x9   :  { %353 = vst.msk [vmem:[#allocation2 + $0x18] sm:$0x7f] %vm352_vm2, %v347_v11  ;;  %360 = vst.msk [vmem:[#allocation2 + $0x38] sm:$0x7f] %vm352_vm2, %v355_v13  ;;  %479 = vmatprep.subr.bf16.mxu0 %v1693_v14  ;;  %v49_v32 = vand.u32 7, %v23_v27  ;;  %vm1796_vm5 = vcmp.eq.s32.totalorder %v42_v28, %v1787_v25  ;;  %v1660_v40 = vld [vmem:[%s2226_s1 + $0x48] sm:$0xff]  }
   0xa   :  { %351 = vst.msk [vmem:[#allocation2 + $0x8] sm:$0xff] %vm300_vm0, %v348_v15  ;;  %359 = vst.msk [vmem:[#allocation2 + $0x28] sm:$0xff] %vm300_vm0, %v356_v16  ;;  %v1661_v41 = vld [vmem:[%s2226_s1 + $0x50] sm:$0xff]   ;;  %v1662_v42 = vld [vmem:[%s2226_s1 + $0x58] sm:$0xff]   ;;  %v24_v56 = vadd.s32 16, %v1785_v24  ;;  %v25_v57 = vadd.s32 24, %v1785_v24 }
   0xb   :  { %318 = vst.msk [vmem:[#allocation2 + $0x10] sm:$0xff] %vm300_vm0, %v313_v18  ;;  %327 = vst.msk [vmem:[#allocation2 + $0x30] sm:$0xff] %vm300_vm0, %v323_v19  ;;  %vm1802_vm6 = vcmp.eq.s32.totalorder %v49_v32, %v1787_v25  ;;  %v26_v62 = vadd.s32 32, %v1785_v24  ;;  %v27_v63 = vadd.s32 40, %v1785_v24  ;;  %v28_v5 = vadd.s32 48, %v1785_v24 }
   0xc   :  { %480 = vmatpush1.bf16.msra.mxu0 %v1653_v20  ;;  %vm2235_vm7 = vmpackc.low %vm1802_vm6, %vm1796_vm5  ;;  %v56_v58 = vand.u32 7, %v24_v56  ;;  %v63_v59 = vand.u32 7, %v25_v57  ;;  %v29_v6 = vadd.s32 56, %v1785_v24  ;;  %v30_v11 = vadd.s32 64, %v1785_v24 }
   0xd   :  { %481 = vmatprep.subr.bf16.mxu0 %v1693_v14  ;;  %1598 = vmatpush3.bf16.msk.msra.mxu1 %vm2235_vm7, %v1695_v36  ;;  %v70_v0 = vand.u32 7, %v26_v62  ;;  %v77_v1 = vand.u32 7, %v27_v63  ;;  %v84_v7 = vand.u32 7, %v28_v5  ;;  %v31_v12 = vadd.s32 72, %v1785_v24 }
   0xe   :  { %1599 = vmatprep.subr.bf16.mxu1 %v1694_v23  ;;  %vm1849_vm9 = vcmp.eq.s32.totalorder %v56_v58, %v1787_v25  ;;  %vm1854_vm10 = vcmp.eq.s32.totalorder %v63_v59, %v1787_v25  ;;  %v91_v8 = vand.u32 7, %v29_v6  ;;  %v98_v13 = vand.u32 7, %v30_v11 }
   0xf   :  { %vm2233_vm11 = vmpackc.low %vm1854_vm10, %vm1849_vm9  ;;  %vm1872_vm12 = vcmp.eq.s32.totalorder %v70_v0, %v1787_v25  ;;  %vm1877_vm13 = vcmp.eq.s32.totalorder %v77_v1, %v1787_v25  ;;  %vm1895_vm15 = vcmp.eq.s32.totalorder %v84_v7, %v1787_v25  ;;  %v2268_v15 = vmov 0 }
  0x10   :  { %482 = vmatpush1.bf16.msra.mxu0 %v1654_v22  ;;  %v364_v30 = vld [vmem:[#allocation2 + $0x18] sm:$0xff]  ;;  %vm2232_vm14 = vmpackc.low %vm1877_vm13, %vm1872_vm12  ;;  %vm1918_vm3 = vcmp.eq.s32.totalorder %v98_v13, %v1787_v25  ;;  %v32_v17 = vadd.s32 80, %v1785_v24  ;;  %v33_v18 = vadd.s32 88, %v1785_v24  ;;  %v2272_v21 = vmov 0 }
  0x11   :  { %v362_v26 = vld [vmem:[#allocation2 + $0x8] sm:$0xff]  ;;  %483 = vmatprep.subr.bf16.mxu0 %v1693_v14  ;;  %v368_v48 = vld [vmem:[#allocation2 + $0x38] sm:$0xff]  ;;  %1601 = vmatpush3.bf16.msk.msra.mxu1 %vm2233_vm11, %v1695_v36  ;;  %v2269_v15 = vsel %vm1918_vm3, 4294967295, %v2268_v15  ;;  %v2274_v22 = vmov 0  ;;  %v35_v27 = vadd.s32 104, %v1785_v24  ;;  %v36_v32 = vadd.s32 112, %v1785_v24 }
  0x12   :  { %v370_v31 = vpack.c.bf16 %v364_v30, %v362_v26  ;;  %v366_v47 = vld [vmem:[#allocation2 + $0x28] sm:$0xff]  ;;  %1602 = vmatprep.subr.bf16.mxu1 %v1694_v23  ;;  %v112_v19 = vand.u32 7, %v32_v17  ;;  %v119_v20 = vand.u32 7, %v33_v18  ;;  %v34_v26 = vadd.s32 96, %v1785_v24 }
  0x13   :  { %v372_v51 = vpack.c.bf16 %v368_v48, %v366_v47  ;;  %v2276_v30 = vmov 0  ;;  %vm2244_vm4 = vmmov 0   ;;  %v284_v17 = vand.u32 7, %v1787_v25 }
  0x14   :  { %1358 = vmatprep.mubr.msk.bf16.mxu0 %vm300_vm0, %v370_v31  ;;  %484 = vmatpush1.bf16.msra.mxu0 %v1655_v29  ;;  %vm1946_vm11 = vcmp.eq.s32.totalorder %v119_v20, %v1787_v25  ;;  %v126_v28 = vand.u32 7, %v34_v26  ;;  %v133_v29 = vand.u32 7, %v35_v27  ;;  %v2278_v31 = vmov 0  ;;  %v1663_v20 = vld [vmem:[%s2227_s2 + $0x40] sm:$0xff]  }
  0x15   :  { %485 = vmatprep.subr.bf16.mxu0 %v1693_v14  ;;  %1604 = vmatpush3.bf16.msk.msra.mxu1 %vm2232_vm14, %v1695_v36  ;;  %vm1941_vm14 = vcmp.eq.s32.totalorder %v112_v19, %v1787_v25  ;;  %v2275_v22 = vsel %vm1946_vm11, 4294967295, %v2274_v22  ;;  %v1697_v19 = vmov 1.0   ;;  %v1665_v26 = vld [vmem:[%s2227_s2 + $0x80] sm:$0xff]  }
  0x16   :  { %1605 = vmatprep.subr.bf16.mxu1 %v1694_v23  ;;  %v2273_v21 = vsel %vm1941_vm14, 4294967295, %v2272_v21  ;;  %vm1964_vm7 = vcmp.eq.s32.totalorder %v126_v28, %v1787_v25  ;;  %vm1969_vm1 = vcmp.eq.s32.totalorder %v133_v29, %v1787_v25  ;;  %1528 = vmatprep.mubr.msk.f32.mxu1 %vm2244_vm4, %v1691_v3 }
  0x17   :  { %v2277_v30 = vsel %vm1964_vm7, 4294967295, %v2276_v30  ;;  %v2279_v31 = vsel %vm1969_vm1, 4294967295, %v2278_v31 }
  0x18   :  { %486 = vmatpush1.bf16.msra.mxu0 %v1656_v35  ;;  %v37_v35 = vadd.s32 120, %v1785_v24 }
  0x19   :  { %487 = vmatprep.subr.bf16.mxu0 %v1693_v14 }
  0x1c   :  { %488 = vmatpush1.bf16.msra.mxu0 %v1657_v37  ;;  %v140_v37 = vand.u32 7, %v36_v32 }
  0x1d   :  { %489 = vmatprep.subr.bf16.mxu0 %v1693_v14 }
  0x20   :  { %490 = vmatpush1.bf16.msra.mxu0 %v1658_v38  ;;  %v147_v38 = vand.u32 7, %v37_v35 }
  0x21   :  { %491 = vmatprep.subr.bf16.mxu0 %v1693_v14 }
  0x24   :  { %492 = vmatpush1.bf16.msra.mxu0 %v1659_v39  ;;  %v2280_v39 = vmov 0 }
  0x25   :  { %493 = vmatprep.subr.bf16.mxu0 %v1693_v14 }
  0x28   :  { %494 = vmatpush1.bf16.msra.mxu0 %v1660_v40  ;;  %v2282_v40 = vmov 0 }
  0x29   :  { %495 = vmatprep.subr.bf16.mxu0 %v1693_v14 }
  0x2c   :  { %496 = vmatpush1.bf16.msra.mxu0 %v1661_v41 }
  0x2d   :  { %497 = vmatprep.subr.bf16.mxu0 %v1693_v14  ;;  %v105_v14 = vand.u32 7, %v31_v12 }
  0x30   :  { %498 = vmatpush1.bf16.msra.mxu0 %v1662_v42 }
  0x31   :  { %1536 = vmatprep.subr.bf16.mxu0 %v1665_v26 }
  0x74   :  { %v329_v43 = vpop.permute.xlu0 %328  ;;  %v333_v44 = vpop.permute.xlu1 %332 }
  0x75   :  { %341 = vst.msk [vmem:[#allocation2] sm:$0xff] %vm340_vm8, %v329_v43  ;;  %343 = vst.msk [vmem:[#allocation2 + $0x20] sm:$0xff] %vm340_vm8, %v333_v44 }
  0x78   :  { %v331_v45 = vpop.permute.xlu0 %330  ;;  %v335_v46 = vpop.permute.xlu1 %334 }
  0x79   :  { %342 = vst.msk [vmem:[#allocation2 + $0x10] sm:$0xff] %vm340_vm8, %v331_v45  ;;  %344 = vst.msk [vmem:[#allocation2 + $0x30] sm:$0xff] %vm340_vm8, %v335_v46  ;;  %vm1923_vm8 = vcmp.eq.s32.totalorder %v105_v14, %v1787_v25 }
  0x7c   :  { %v361_v49 = vld [vmem:[#allocation2] sm:$0xff] }
  0x7d   :  { %v365_v53 = vld [vmem:[#allocation2 + $0x20] sm:$0xff] }
  0x80   :  { %v363_v50 = vld [vmem:[#allocation2 + $0x10] sm:$0xff] }
  0x81   :  { %v369_v52 = vpack.c.bf16 %v363_v50, %v361_v49  ;;  %v367_v54 = vld [vmem:[#allocation2 + $0x30] sm:$0xff] }
  0x82   :  { %v371_v55 = vpack.c.bf16 %v367_v54, %v365_v53 }
  0x83   :  { %508 = vmatmul.mubr.bf16.vlgmr.msra.gmra.mrb[0].mxu0 %v369_v52 }
  0x84   :  { %1359 = vmatprep.mubr.msk.bf16.mxu0 %vm300_vm0, %v372_v51  ;;  %vm1900_vm0 = vcmp.eq.s32.totalorder %v91_v8, %v1787_v25  ;;  %1537 = vmatpush3.bf16.msra.mxu0 %v1665_v26  ;;  %v1686_v26 = vld [vmem:[%s2227_s2 + $0xb8] sm:$0xff]  }
  0x85   :  { %vm2231_vm2 = vmpackc.low %vm1900_vm0, %vm1895_vm15 }
  0x86   :  { %1607 = vmatpush3.bf16.msk.msra.mxu1 %vm2231_vm2, %v1695_v36  ;;  %vm2234_vm2 = vmpackc.low %vm1923_vm8, %vm1918_vm3 }
  0x87   :  { %1608 = vmatprep.subr.bf16.mxu1 %v1694_v23 }
  0x8a   :  { %1610 = vmatpush3.bf16.msk.msra.mxu1 %vm2234_vm2, %v1695_v36  ;;  %vm2237_vm2 = vmpackc.low %vm1946_vm11, %vm1941_vm14  ;;  %vm1989_vm14 = vcmp.eq.s32.totalorder %v140_v37, %v1787_v25  ;;  %vm1994_vm11 = vcmp.eq.s32.totalorder %v147_v38, %v1787_v25  ;;  %v1668_v25 = vld [vmem:[%s2227_s2 + $0x88] sm:$0xff]  }
  0x8b   :  { %516 = vmatmul.mubr.bf16.gmra.mrb[4].mxu0 %v371_v55  ;;  %1611 = vmatprep.subr.bf16.mxu1 %v1694_v23  ;;  %v2281_v39 = vsel %vm1989_vm14, 4294967295, %v2280_v39  ;;  %v2283_v40 = vsel %vm1994_vm11, 4294967295, %v2282_v40 }
  0x8c   :  { %1538 = vmatprep.subr.bf16.mxu0 %v1668_v25 }
  0x8d   :  { %1539 = vmatpush3.bf16.msra.mxu0 %v1668_v25  ;;  %v1685_v25 = vld [vmem:[%s2227_s2 + $0x38] sm:$0xff]  }
  0x8e   :  { %1613 = vmatpush3.bf16.msk.msra.mxu1 %vm2237_vm2, %v1695_v36  ;;  %vm2241_vm2 = vmpackc.low %vm1969_vm1, %vm1964_vm7  ;;  %vm2288_vm1 = vcmask 1040384  }
  0x8f   :  { %1614 = vmatprep.subr.bf16.mxu1 %v1694_v23  ;;  %vm2289_vm3 = vmmov %vm2288_vm1 }
  0x92   :  { %1616 = vmatpush3.bf16.msk.msra.mxu1 %vm2241_vm2, %v1695_v36  ;;  %vm2242_vm2 = vmpackc.low %vm1994_vm11, %vm1989_vm14  ;;  %vm2034_vm14 = vcmp.eq.s32.totalorder %v1785_v24, %v284_v17  ;;  %vm2287_vm11 = vcmask 1040384   ;;  %v1683_v17 = vld [vmem:[%s2227_s2 + $0xb0] sm:$0xff]  }
  0x93   :  { %1617 = vmatprep.subr.bf16.mxu1 %v1694_v23 }
  0x96   :  { %1619 = vmatpush3.bf16.msk.msra.mxu1 %vm2242_vm2, %v1695_v36  ;;  %vm2284_vm2 = vcmask 1040384  }
  0x97   :  { %1531 = vmatprep.subr.mxu1 %v1691_v3 }
 0x156   :  { %v2009_v41 = vpop.f32.mrb[0].mxu0 }
 0x157   :  { %v511_v42 = vpop.f32.mrb[1].mxu0  ;;  %v534_v44 = vmul.f32 %v2009_v41, %v2009_v41 }
 0x158   :  { %v2011_v43 = vpop.f32.mrb[2].mxu0 }
 0x159   :  { %v525_v45 = vadd.f32 %v2011_v43, %v2009_v41  ;;  %v535_v46 = vmul.f32 %v2011_v43, %v2011_v43  ;;  %v514_v47 = vpop.f32.mrb[3].mxu0 }
 0x15b   :  { %v538_v48 = vadd.f32 %v535_v46, %v534_v44 }
 0x15e   :  { %v2019_v49 = vpop.f32.mrb[4].mxu0 }
 0x15f   :  { %v526_v50 = vadd.f32 %v525_v45, %v2019_v49  ;;  %v536_v51 = vmul.f32 %v2019_v49, %v2019_v49  ;;  %v519_v52 = vpop.f32.mrb[5].mxu0  ;;  %v524_v45 = vld [vmem:[%s2228_s3] sm:$0x7] }
 0x160   :  { %v2024_v53 = vpop.f32.mrb[6].mxu0  ;;  %v1664_v52 = vld [vmem:[%s2227_s2] sm:$0xff]  }
 0x161   :  { %v539_v54 = vadd.f32 %v538_v48, %v536_v51  ;;  %v527_v55 = vadd.f32 %v526_v50, %v2024_v53  ;;  %v537_v56 = vmul.f32 %v2024_v53, %v2024_v53  ;;  %v522_v57 = vpop.f32.mrb[7].mxu0 }
 0x162   :  { %v1667_v57 = vld [vmem:[%s2227_s2 + $0x8] sm:$0xff]  }
 0x163   :  { %v528_v58 = vrot.slane %v527_v55, 4  ;;  %v540_v59 = vadd.f32 %v539_v54, %v537_v56 }
 0x165   :  { %v529_v62 = vadd.f32 %v528_v58, %v527_v55  ;;  %v541_v63 = vrot.slane %v540_v59, 4  ;;  %v1666_v55 = vld [vmem:[%s2227_s2 + $0x48] sm:$0xff]   ;;  %v1669_v58 = vld [vmem:[%s2227_s2 + $0x50] sm:$0xff]  }
 0x167   :  { %v530_v0 = vrot.slane %v529_v62, 2  ;;  %v542_v1 = vadd.f32 %v541_v63, %v540_v59  ;;  %v1670_v59 = vld [vmem:[%s2227_s2 + $0x10] sm:$0xff]   ;;  %v1672_v63 = vld [vmem:[%s2227_s2 + $0x58] sm:$0xff]  }
 0x169   :  { %v531_v5 = vadd.f32 %v530_v0, %v529_v62  ;;  %v543_v6 = vrot.slane %v542_v1, 2  ;;  %v1671_v62 = vld [vmem:[%s2227_s2 + $0x90] sm:$0xff]   ;;  %v1673_v0 = vld [vmem:[%s2227_s2 + $0x18] sm:$0xff]  }
 0x16a   :  { %1540 = vmatprep.subr.bf16.mxu0 %v1671_v62 }
 0x16b   :  { %v532_v7 = vrot.slane %v531_v5, 1  ;;  %v544_v8 = vadd.f32 %v543_v6, %v542_v1  ;;  %1541 = vmatpush3.bf16.msra.mxu0 %v1671_v62  ;;  %v1674_v1 = vld [vmem:[%s2227_s2 + $0x98] sm:$0xff]   ;;  %v1676_v6 = vld [vmem:[%s2227_s2 + $0x20] sm:$0xff]  }
 0x16c   :  { %1542 = vmatprep.subr.bf16.mxu0 %v1674_v1 }
 0x16d   :  { %v545_v11 = vrot.slane %v544_v8, 1  ;;  %v533_v12 = vadd.f32 %v532_v7, %v531_v5  ;;  %v1675_v5 = vld [vmem:[%s2227_s2 + $0x60] sm:$0xff]  }
 0x16e   :  { %v1677_v7 = vld [vmem:[%s2227_s2 + $0xa0] sm:$0xff]  }
 0x16f   :  { %v546_v13 = vadd.f32 %v545_v11, %v544_v8  ;;  %1543 = vmatpush3.bf16.msra.mxu0 %v1674_v1  ;;  %v1678_v8 = vld [vmem:[%s2227_s2 + $0x68] sm:$0xff]  }
 0x170   :  { %1544 = vmatprep.subr.bf16.mxu0 %v1677_v7  ;;  %v1679_v11 = vld [vmem:[%s2227_s2 + $0x28] sm:$0xff]  }
 0x171   :  { %v547_v14 = vsel %vm2284_vm2, %v533_v12, %v546_v13  ;;  %vm2248_vm2 = vcmask 1041408   ;;  %v1680_v12 = vld [vmem:[%s2227_s2 + $0xa8] sm:$0xff]   ;;  %v1681_v13 = vld [vmem:[%s2227_s2 + $0x70] sm:$0xff]  }
 0x172   :  { %1529 = vmatmul.mubr.f32.vlgmr.msra.gmra.mrb[0].mxu1 %v547_v14  ;;  %v1682_v14 = vld [vmem:[%s2227_s2 + $0x30] sm:$0xff]  }
 0x173   :  { %1533 = vmatprep.mubr.msk.f32.mxu1 %vm2244_vm4, %v1691_v3  ;;  %1532 = vmatpush3.msk.msra.mxu1 %vm2034_vm14, %v1697_v19  ;;  %vm2247_vm4 = vcmask 64512  }
 0x174   :  { %1439 = vmatprep.subr.bf16.mxu1 %v1663_v20  ;;  %1545 = vmatpush3.bf16.msra.mxu0 %v1677_v7  ;;  %v1684_v20 = vld [vmem:[%s2227_s2 + $0x78] sm:$0xff]  }
 0x175   :  { %1546 = vmatprep.subr.bf16.mxu0 %v1680_v12 }
 0x178   :  { %1547 = vmatpush3.bf16.msra.mxu0 %v1680_v12 }
 0x179   :  { %1548 = vmatprep.subr.bf16.mxu0 %v1683_v17 }
 0x17c   :  { %1549 = vmatpush3.bf16.msra.mxu0 %v1683_v17 }
 0x17d   :  { %1550 = vmatprep.subr.bf16.mxu0 %v1686_v26 }
 0x180   :  { %1551 = vmatpush3.bf16.msra.mxu0 %v1686_v26 }
 0x181   :  { %1591 = vmatprep.subr.mxu0 %v1691_v3 }
 0x245   :  { %v614_v27 = vpop.f32.mrb[0].mxu1 }
 0x246   :  { %v619_v28 = vmul.f32 0.001953125, %v614_v27  ;;  %v1530_v29 = vpop.f32.mrb[1].mxu1  ;;  %v716_v27 = vsub.s32 0, %v1785_v24 }
 0x248   :  { %v620_v32 = vmul.f32 %v619_v28, %v619_v28 }
 0x24a   :  { %v622_v35 = vrot.slane %v620_v32, 7 }
 0x24c   :  { %v624_v37 = vsub.f32 %v619_v28, %v622_v35 }
 0x24e   :  { %v625_v38 = vmax.f32 %v624_v37, 0.0 }
 0x250   :  { %v626_v42 = vadd.f32 1e-05, %v625_v38  ;;  %v736_v38 = vsub.s32 2, %v1785_v24 }
 0x252   :  { %1687 = vrsqrt.f32 %v626_v42 }
 0x25c   :  { %v1688_v44 = vpop.eup %1687 }
 0x25d   :  { %v629_v46 = vrot.slane %v1688_v44, 1 }
 0x25f   :  { %v631_v47 = vmul.f32 %v629_v46, %v524_v45 }
 0x261   :  { %v632_v48 = vmul.f32 %v631_v47, %v619_v28  ;;  %v724_v28 = vsub.s32 1, %v1785_v24 }
 0x263   :  { %v634_v50 = vrot.slane %v632_v48, 7 }
 0x265   :  { %v636_v51 = vsub.f32 %v524_v45, %v634_v50 }
 0x267   :  { %v637_v54 = vsel %vm2287_vm11, %v631_v47, %v636_v51 }
 0x268   :  { %v639_v56 = vsel %vm2248_vm2, %v637_v54, %v524_v45 }
 0x269   :  { %1534 = vmatmul.mubr.msk.f32.vlgmr.msra.gmra.mrb[2].mxu1 %vm2247_vm4, %v639_v56 }
 0x26a   :  { %1440 = vmatpush3.bf16.msra.mxu1 %v1664_v52 }
 0x26b   :  { %1441 = vmatprep.subr.bf16.mxu1 %v1666_v55 }
 0x26e   :  { %1442 = vmatpush3.bf16.msra.mxu1 %v1667_v57 }
 0x26f   :  { %1443 = vmatprep.subr.bf16.mxu1 %v1669_v58 }
 0x272   :  { %1444 = vmatpush3.bf16.msra.mxu1 %v1670_v59 }
 0x273   :  { %1445 = vmatprep.subr.bf16.mxu1 %v1672_v63 }
 0x276   :  { %1446 = vmatpush3.bf16.msra.mxu1 %v1673_v0 }
 0x277   :  { %1447 = vmatprep.subr.bf16.mxu1 %v1675_v5 }
 0x27a   :  { %1448 = vmatpush3.bf16.msra.mxu1 %v1676_v6 }
 0x27b   :  { %1449 = vmatprep.subr.bf16.mxu1 %v1678_v8 }
 0x27e   :  { %1450 = vmatpush3.bf16.msra.mxu1 %v1679_v11 }
 0x27f   :  { %1451 = vmatprep.subr.bf16.mxu1 %v1681_v13 }
 0x282   :  { %1452 = vmatpush3.bf16.msra.mxu1 %v1682_v14 }
 0x283   :  { %1453 = vmatprep.subr.bf16.mxu1 %v1684_v20 }
 0x286   :  { %1454 = vmatpush3.bf16.msra.mxu1 %v1685_v25 }
 0x287   :  { %1620 = vmatprep.subr.bf16.mxu1 %v1694_v23 }
 0x33c   :  { %v710_v29 = vpop.f32.mrb[2].mxu1 }
 0x33d   :  { %v717_v32 = vrot.slane %v710_v29, %v716_v27  ;;  %v1535_v35 = vpop.f32.mrb[3].mxu1  ;;  %v725_v37 = vrot.slane %v710_v29, %v724_v28  ;;  %v737_v52 = vrot.slane %v710_v29, %v736_v38 }
 0x33f   :  { %v718_v42 = vmul.f32 %v717_v32, %v2009_v41  ;;  %v719_v44 = vmul.f32 %v717_v32, %v2011_v43  ;;  %v720_v45 = vmul.f32 %v717_v32, %v2019_v49  ;;  %v721_v46 = vmul.f32 %v717_v32, %v2024_v53 }
 0x341   :  { %v726_v47 = vadd.f32 %v725_v37, %v718_v42  ;;  %v727_v48 = vadd.f32 %v725_v37, %v719_v44  ;;  %v728_v50 = vadd.f32 %v725_v37, %v720_v45  ;;  %v729_v51 = vadd.f32 %v725_v37, %v721_v46 }
 0x343   :  { %vm730_vm11 = vcmp.ge.f32.partialorder %v726_v47, 0.0  ;;  %vm731_vm4 = vcmp.ge.f32.partialorder %v727_v48, 0.0  ;;  %vm732_vm2 = vcmp.ge.f32.partialorder %v728_v50, 0.0  ;;  %vm733_vm7 = vcmp.ge.f32.partialorder %v729_v51, 0.0 }
 0x344   :  { %v738_v54 = vmul.f32 %v737_v52, %v726_v47  ;;  %v739_v55 = vmul.f32 %v737_v52, %v727_v48  ;;  %v740_v41 = vmul.f32 %v737_v52, %v728_v50  ;;  %v741_v56 = vmul.f32 %v737_v52, %v729_v51 }
 0x346   :  { %v742_v43 = vsel %vm730_vm11, %v726_v47, %v738_v54  ;;  %v743_v57 = vsel %vm731_vm4, %v727_v48, %v739_v55  ;;  %v744_v49 = vsel %vm732_vm2, %v728_v50, %v740_v41  ;;  %v745_v58 = vsel %vm733_vm7, %v729_v51, %v741_v56 }
 0x347   :  { %v760_v53 = vrot.slane %v742_v43, 7  ;;  %v761_v59 = vrot.slane %v743_v57, 7  ;;  %v769_v62 = vrot.slane %v744_v49, 7  ;;  %v770_v63 = vrot.slane %v745_v58, 7 }
 0x348   :  { %v780_v0 = vrot.slane %v742_v43, 1  ;;  %v781_v1 = vrot.slane %v743_v57, 1  ;;  %v787_v5 = vrot.slane %v744_v49, 1  ;;  %v788_v6 = vrot.slane %v745_v58, 1 }
 0x349   :  { %v762_v7 = vsel %vm2288_vm1, %v760_v53, %v761_v59  ;;  %765 = vst [vmem:[#allocation3] sm:$0xfe] %v760_v53  ;;  %v771_v8 = vsel %vm2289_vm3, %v769_v62, %v770_v63  ;;  %774 = vst [vmem:[#allocation3 + $0x30] sm:$0xfe] %v769_v62  ;;  %v807_v11 = vpack.c.bf16 %v743_v57, %v742_v43  ;;  %vm2290_vm11 = vcmask 1046528  }
 0x34a   :  { %v810_v12 = vpack.c.bf16 %v745_v58, %v744_v49  ;;  %v782_v13 = vsel %vm2290_vm11, %v780_v0, %v781_v1  ;;  %786 = vst [vmem:[#allocation3 + $0x28] sm:$0x7f] %v781_v1  ;;  %vm2291_vm4 = vmmov %vm2290_vm11  ;;  %vm2293_vm7 = vmmov 0   ;;  %vm2306_vm11 = vnez %v2281_v39 }
 0x34b   :  { %v789_v14 = vsel %vm2291_vm4, %v787_v5, %v788_v6  ;;  %793 = vst [vmem:[#allocation3 + $0x58] sm:$0x7f] %v788_v6  ;;  %1036 = vmatprep.mubr.bf16.mxu1 %v807_v11  ;;  %vm2292_vm1 = vmpackc.low %vm1802_vm6, %vm1796_vm5 }
 0x34c   :  { %vm2294_vm3 = vmpackc.low %vm1854_vm10, %vm1849_vm9  ;;  %vm2297_vm9 = vnez %v2269_v15 }
 0x34d   :  { %vm2295_vm5 = vmpackc.low %vm1877_vm13, %vm1872_vm12  ;;  %vm2299_vm12 = vnez %v2275_v22  ;;  %vm2300_vm13 = vnez %v2273_v21 }
 0x34e   :  { %vm2296_vm6 = vmpackc.low %vm1900_vm0, %vm1895_vm15  ;;  %vm2302_vm15 = vnez %v2279_v31  ;;  %vm2303_vm0 = vnez %v2277_v30 }
 0x34f   :  { %vm2298_vm10 = vmpackc.low %vm1923_vm8, %vm2297_vm9  ;;  %vm2305_vm8 = vnez %v2283_v40 }
 0x350   :  { %v794_v17 = vld [vmem:[#allocation3] sm:$0xff]  ;;  %v800_v35 = vld [vmem:[#allocation3 + $0x30] sm:$0xff]  ;;  %vm2304_vm2 = vmpackc.low %vm2302_vm15, %vm2303_vm0 }
 0x351   :  { %v806_v20 = vpack.c.bf16 %v762_v7, %v794_v17  ;;  %v799_v26 = vld [vmem:[#allocation3 + $0x28] sm:$0xff]  ;;  %v809_v37 = vpack.c.bf16 %v771_v8, %v800_v35  ;;  %vm2307_vm4 = vmpackc.low %vm2305_vm8, %vm2306_vm11  ;;  %v1102_v17 = vld [vmem:[%s2229_s4] sm:$0x7] }
 0x352   :  { %v805_v25 = vld [vmem:[#allocation3 + $0x58] sm:$0xff]  ;;  %v808_v29 = vpack.c.bf16 %v799_v26, %v782_v13 }
 0x353   :  { %v811_v32 = vpack.c.bf16 %v805_v25, %v789_v14  ;;  %1037 = vmatmul.mubr.bf16.vlgmr.msra.gmra.mrb[4].mxu1 %v806_v20 }
 0x354   :  { %1552 = vmatprep.mubr.bf16.mxu0 %v808_v29  ;;  %1044 = vmatprep.mubr.bf16.mxu1 %v810_v12 }
 0x355   :  { %1553 = vmatmul.mubr.bf16.vlgmr.msra.gmra.mrb[8].mxu0 %v811_v32  ;;  %1622 = vmatpush3.bf16.msk.msra.mxu1 %vm2292_vm1, %v1695_v36  ;;  %vm2308_vm1 = vcmask 1040384  }
 0x356   :  { %1623 = vmatprep.subr.bf16.mxu1 %v1694_v23  ;;  %1592 = vmatpush3.msk.msra.mxu0 %vm2034_vm14, %v1697_v19  ;;  %vm2301_vm14 = vmpackc.low %vm2299_vm12, %vm2300_vm13 }
 0x357   :  { %1593 = vmatprep.mubr.msk.f32.mxu0 %vm2293_vm7, %v1691_v3 }
 0x359   :  { %1625 = vmatpush3.bf16.msk.msra.mxu1 %vm2294_vm3, %v1695_v36  ;;  %vm2310_vm3 = vcmask 1041408  }
 0x35a   :  { %1626 = vmatprep.subr.bf16.mxu1 %v1694_v23 }
 0x35b   :  { %1045 = vmatmul.mubr.bf16.gmra.mrb[8].mxu1 %v809_v37 }
 0x35c   :  { %1588 = vmatprep.mubr.msk.f32.mxu1 %vm2293_vm7, %v1691_v3  ;;  %vm2309_vm7 = vmmov %vm2308_vm1 }
 0x35d   :  { %1628 = vmatpush3.bf16.msk.msra.mxu1 %vm2295_vm5, %v1695_v36  ;;  %vm2311_vm5 = vcmask 64512  }
 0x35e   :  { %1629 = vmatprep.subr.bf16.mxu1 %v1694_v23 }
 0x361   :  { %1631 = vmatpush3.bf16.msk.msra.mxu1 %vm2296_vm6, %v1695_v36 }
 0x362   :  { %1632 = vmatprep.subr.bf16.mxu1 %v1694_v23 }
 0x365   :  { %1634 = vmatpush3.bf16.msk.msra.mxu1 %vm2298_vm10, %v1695_v36 }
 0x366   :  { %1635 = vmatprep.subr.bf16.mxu1 %v1694_v23 }
 0x369   :  { %1637 = vmatpush3.bf16.msk.msra.mxu1 %vm2301_vm14, %v1695_v36 }
 0x36a   :  { %1638 = vmatprep.subr.bf16.mxu1 %v1694_v23 }
 0x36d   :  { %1640 = vmatpush3.bf16.msk.msra.mxu1 %vm2304_vm2, %v1695_v36 }
 0x36e   :  { %1641 = vmatprep.subr.bf16.mxu1 %v1694_v23 }
 0x371   :  { %1643 = vmatpush3.bf16.msk.msra.mxu1 %vm2307_vm4, %v1695_v36 }
 0x426   :  { %v1455_v3 = vpop.f32.mrb[4].mxu1 }
 0x427   :  { %v1456_v33 = vpop.f32.mrb[5].mxu1 }
 0x428   :  { %v1457_v34 = vadd.f32 %v1456_v33, %v1455_v3  ;;  %v1554_v60 = vpop.f32.mrb[8].mxu0  ;;  %v1458_v61 = vpop.f32.mrb[6].mxu1 }
 0x429   :  { %v1087_v2 = vpop.f32.mrb[9].mxu0  ;;  %v1459_v4 = vpop.f32.mrb[7].mxu1 }
 0x42a   :  { %v1088_v9 = vadd.f32 %v1457_v34, %v1087_v2  ;;  %v1460_v10 = vadd.f32 %v1459_v4, %v1458_v61  ;;  %v1555_v15 = vpop.f32.mrb[10].mxu0 }
 0x42b   :  { %v1090_v16 = vpop.f32.mrb[11].mxu0 }
 0x42c   :  { %v1091_v21 = vadd.f32 %v1460_v10, %v1090_v16  ;;  %v1112_v18 = vmul.f32 %v1088_v9, %v1088_v9 }
 0x42e   :  { %v1461_v23 = vpop.f32.mrb[8].mxu1  ;;  %v1113_v30 = vmul.f32 %v1091_v21, %v1091_v21  ;;  %v1103_v36 = vadd.f32 %v1091_v21, %v1088_v9 }
 0x42f   :  { %v1462_v22 = vpop.f32.mrb[9].mxu1 }
 0x430   :  { %v1463_v31 = vadd.f32 %v1462_v22, %v1461_v23  ;;  %v1464_v40 = vpop.f32.mrb[10].mxu1  ;;  %v1116_v44 = vadd.f32 %v1113_v30, %v1112_v18 }
 0x431   :  { %v1465_v39 = vpop.f32.mrb[11].mxu1 }
 0x432   :  { %v1096_v19 = vadd.f32 %v1554_v60, %v1463_v31  ;;  %v1466_v42 = vadd.f32 %v1465_v39, %v1464_v40 }
 0x434   :  { %v1104_v45 = vadd.f32 %v1103_v36, %v1096_v19  ;;  %v1114_v46 = vmul.f32 %v1096_v19, %v1096_v19  ;;  %v1099_v47 = vadd.f32 %v1555_v15, %v1466_v42 }
 0x436   :  { %v1117_v48 = vadd.f32 %v1116_v44, %v1114_v46  ;;  %v1105_v50 = vadd.f32 %v1104_v45, %v1099_v47  ;;  %v1115_v51 = vmul.f32 %v1099_v47, %v1099_v47 }
 0x438   :  { %v1106_v52 = vrot.slane %v1105_v50, 4  ;;  %v1118_v54 = vadd.f32 %v1117_v48, %v1115_v51 }
 0x43a   :  { %v1107_v55 = vadd.f32 %v1106_v52, %v1105_v50  ;;  %v1119_v41 = vrot.slane %v1118_v54, 4 }
 0x43c   :  { %v1108_v56 = vrot.slane %v1107_v55, 2  ;;  %v1120_v43 = vadd.f32 %v1119_v41, %v1118_v54 }
 0x43e   :  { %v1109_v57 = vadd.f32 %v1108_v56, %v1107_v55  ;;  %v1121_v49 = vrot.slane %v1120_v43, 2 }
 0x440   :  { %v1110_v58 = vrot.slane %v1109_v57, 1  ;;  %v1122_v53 = vadd.f32 %v1121_v49, %v1120_v43 }
 0x442   :  { %v1123_v59 = vrot.slane %v1122_v53, 1  ;;  %v1111_v62 = vadd.f32 %v1110_v58, %v1109_v57 }
 0x444   :  { %v1124_v63 = vadd.f32 %v1123_v59, %v1122_v53 }
 0x446   :  { %v1125_v0 = vsel %vm2308_vm1, %v1111_v62, %v1124_v63 }
 0x447   :  { %1589 = vmatmul.mubr.f32.vlgmr.msra.gmra.mrb[12].mxu1 %v1125_v0 }
 0x51a   :  { %v1192_v1 = vpop.f32.mrb[12].mxu1 }
 0x51b   :  { %v1196_v5 = vmul.f32 0.001953125, %v1192_v1  ;;  %v1590_v6 = vpop.f32.mrb[13].mxu1 }
 0x51d   :  { %v1197_v7 = vmul.f32 %v1196_v5, %v1196_v5 }
 0x51f   :  { %v1199_v8 = vrot.slane %v1197_v7, 7 }
 0x521   :  { %v1201_v11 = vsub.f32 %v1196_v5, %v1199_v8 }
 0x523   :  { %v1202_v12 = vmax.f32 %v1201_v11, 0.0 }
 0x525   :  { %v1203_v13 = vadd.f32 1e-05, %v1202_v12 }
 0x527   :  { %1689 = vrsqrt.f32 %v1203_v13 }
 0x531   :  { %v1690_v14 = vpop.eup %1689 }
 0x532   :  { %v1206_v20 = vrot.slane %v1690_v14, 1 }
 0x534   :  { %v1208_v26 = vmul.f32 %v1206_v20, %v1102_v17 }
 0x536   :  { %v1209_v25 = vmul.f32 %v1208_v26, %v1196_v5 }
 0x538   :  { %v1211_v29 = vrot.slane %v1209_v25, 7 }
 0x53a   :  { %v1213_v32 = vsub.f32 %v1102_v17, %v1211_v29 }
 0x53c   :  { %v1214_v35 = vsel %vm2309_vm7, %v1208_v26, %v1213_v32 }
 0x53d   :  { %v1215_v37 = vsel %vm2310_vm3, %v1214_v35, %v1102_v17 }
 0x53e   :  { %1594 = vmatmul.mubr.msk.f32.vlgmr.msra.gmra.mrb[12].mxu0 %vm2311_vm5, %v1215_v37 }
 0x611   :  { %v1285_v3 = vpop.f32.mrb[12].mxu0 }
 0x612   :  { %v1292_v33 = vrot.slane %v1285_v3, %v716_v27  ;;  %v1595_v34 = vpop.f32.mrb[13].mxu0  ;;  %v1300_v60 = vrot.slane %v1285_v3, %v724_v28  ;;  %v1312_v30 = vrot.slane %v1285_v3, %v736_v38 }
 0x614   :  { %v1293_v61 = vmul.f32 %v1292_v33, %v1088_v9  ;;  %v1294_v2 = vmul.f32 %v1292_v33, %v1091_v21  ;;  %v1295_v4 = vmul.f32 %v1292_v33, %v1096_v19  ;;  %v1296_v10 = vmul.f32 %v1292_v33, %v1099_v47 }
 0x616   :  { %v1301_v15 = vadd.f32 %v1300_v60, %v1293_v61  ;;  %v1302_v16 = vadd.f32 %v1300_v60, %v1294_v2  ;;  %v1303_v23 = vadd.f32 %v1300_v60, %v1295_v4  ;;  %v1304_v22 = vadd.f32 %v1300_v60, %v1296_v10 }
 0x618   :  { %vm1305_vm6 = vcmp.ge.f32.partialorder %v1301_v15, 0.0  ;;  %vm1306_vm9 = vcmp.ge.f32.partialorder %v1302_v16, 0.0  ;;  %vm1307_vm10 = vcmp.ge.f32.partialorder %v1303_v23, 0.0  ;;  %vm1308_vm12 = vcmp.ge.f32.partialorder %v1304_v22, 0.0 }
 0x619   :  { %v1313_v27 = vmul.f32 %v1312_v30, %v1301_v15  ;;  %v1314_v31 = vmul.f32 %v1312_v30, %v1302_v16  ;;  %v1315_v40 = vmul.f32 %v1312_v30, %v1303_v23  ;;  %v1316_v39 = vmul.f32 %v1312_v30, %v1304_v22 }
 0x61b   :  { %v1317_v28 = vsel %vm1305_vm6, %v1301_v15, %v1313_v27  ;;  %v1318_v9 = vsel %vm1306_vm9, %v1302_v16, %v1314_v31  ;;  %v1319_v21 = vsel %vm1307_vm10, %v1303_v23, %v1315_v40  ;;  %v1320_v18 = vsel %vm1308_vm12, %v1304_v22, %v1316_v39 }
 0x61c   :  { %1321 = vst [vmem:[%s2230_s5] sm:$0xff] %v1317_v28  ;;  %1322 = vst [vmem:[%s2230_s5 + $0x8] sm:$0xff] %v1318_v9 }
 0x61d   :  { %1323 = vst [vmem:[%s2230_s5 + $0x10] sm:$0xff] %v1319_v21  ;;  %1324 = vst [vmem:[%s2230_s5 + $0x18] sm:$0xff] %v1320_v18 }

</bundles_post_ra>
